<compile_context>
chip_gen: v6e
topology: v6e:2x2x1
jax: 0.10.0
libtpu: 0.0.40
codegen_flags: <defaults>
</compile_context>

<pallas_src>
import jax
import jax.numpy as jnp
from jax.experimental import pallas as pl
from jax.experimental.pallas import tpu as pltpu

NUM_LAYERS = 16   # default of WeightedMeanReduction(num_layers=16)
TOKEN_IDX = 64    # hard-coded token selection in the PyTorch forward


def weighted_mean_kernel(w_ref, hs_ref, o_ref):
    # w_ref : (1, L, 1)   softmax-normalized per-layer weights (f32, from wrapper)
    # hs_ref: (B, L, TD)  token-64 hidden states for this D tile (f32 or bf16)
    # o_ref : (B, TD)     weighted mean over layers
    hs = hs_ref[...].astype(jnp.float32)   # upcast in-kernel (bf16 inputs halve HBM reads)
    o_ref[...] = jnp.sum(hs * w_ref[...], axis=1).astype(o_ref.dtype)


def _choose_tile_d(D, max_tile_d):
    """Largest lane-aligned (x128) divisor of D, capped, keeping >=2 grid steps when possible."""
    cap = min(max_tile_d, D)
    if D >= 256:
        cap = min(cap, D // 2)   # keep >=2 'parallel' steps so both v7x TensorCores get work
    tile = 128
    for t in range(128, cap + 1, 128):
        if D % t == 0:
            tile = t
    return tile


def weighted_mean_reduction(hidden_states_bltd, weight_matrix,
                            out_dtype=jnp.float32, max_tile_d=1024):
    """Pallas equivalent of WeightedMeanReduction.forward.

    hidden_states_bltd: [B, L, T, D] float array (extractor output, "detached").
    weight_matrix:      [L] raw learnable weights (softmax applied here, once).
    Returns:            [B, D].
    """
    B, L, T, D = hidden_states_bltd.shape
    assert T > TOKEN_IDX, "sequence must contain token index 64"
    assert D % 128 == 0, "hidden dim must be lane-aligned (multiple of 128)"

    # Token slice only: B*L*D elements of HBM traffic (NOT a full-tensor transpose).
    hs_bld = hidden_states_bltd[:, :, TOKEN_IDX, :]                        # [B, L, D]
    # Softmax once, outside the per-tile body (tiny L-vector XLA op).
    w = jax.nn.softmax(weight_matrix.astype(jnp.float32), axis=-1).reshape(1, L, 1)

    tile_d = _choose_tile_d(D, max_tile_d)
    grid = (D // tile_d,)

    # Explicit VMEM budget: double-buffered input + output blocks (+ headroom).
    in_block = B * L * tile_d * jnp.dtype(hidden_states_bltd.dtype).itemsize
    out_block = B * tile_d * jnp.dtype(out_dtype).itemsize
    vmem_need = 2 * (in_block + out_block) + (1 << 20)
    vmem_limit = int(min(max(2 * vmem_need, 32 << 20), 64 << 20))  # cap at v7x physical
    # TODO(synk): for very large B (e.g. B>=256 with tile_d>=1024) add a second
    # 'parallel' grid axis over B instead of relying on a single wide block.

    return pl.pallas_call(
        weighted_mean_kernel,
        out_shape=jax.ShapeDtypeStruct((B, D), out_dtype),
        grid=grid,
        in_specs=[
            pl.BlockSpec((1, L, 1), lambda j: (0, 0, 0)),        # normalized weights, replicated
            pl.BlockSpec((B, L, tile_d), lambda j: (0, 0, j)),   # token-64 slab, D tile j
        ],
        out_specs=pl.BlockSpec((B, tile_d), lambda j: (0, j)),
        compiler_params=pltpu.CompilerParams(
            dimension_semantics=("parallel",),
            vmem_limit_bytes=vmem_limit,
        ),
    )(w, hs_bld)


if __name__ == "__main__":
    # Small, deterministic synthetic inputs consistent with the forward pass.
    B, L, T, D = 2, NUM_LAYERS, 72, 1024   # seq must exceed token index 64
    key = jax.random.PRNGKey(0)
    k_hs, k_w = jax.random.split(key)

    # Synthetic "extractor output" (what extract_input_hidden_states_for_layers returns).
    hidden_states = jax.random.normal(k_hs, (B, L, T, D), dtype=jnp.float32)
    # nn.Parameter(torch.rand(num_layers)) -> uniform [0, 1) init, deterministic here.
    weight_matrix = jax.random.uniform(k_w, (L,), dtype=jnp.float32)

    out = jax.block_until_ready(weighted_mean_reduction(hidden_states, weight_matrix))

    # Pure-JAX reference of the PyTorch forward.
    w_sm = jax.nn.softmax(weight_matrix, axis=0)
    ref = jnp.einsum("bld,l->bd", hidden_states[:, :, TOKEN_IDX, :], w_sm)
    assert out.shape == (B, D)
    assert jnp.allclose(out, ref, atol=1e-5, rtol=1e-5), "mismatch vs reference (f32)"

    # bf16 input path (halves HBM read bytes on this bandwidth-bound kernel).
    hs_bf16 = hidden_states.astype(jnp.bfloat16)
    out_bf16 = jax.block_until_ready(weighted_mean_reduction(hs_bf16, weight_matrix))
    ref_bf16 = jnp.einsum(
        "bld,l->bd", hs_bf16[:, :, TOKEN_IDX, :].astype(jnp.float32), w_sm
    )
    assert jnp.allclose(out_bf16, ref_bf16, atol=1e-3, rtol=1e-3), "mismatch vs reference (bf16)"

    print("KERNEL_OK")
</pallas_src>

<mosaic_0001>
module attributes {stable_mosaic.version = 11 : i64} {
  func.func @weighted_mean_kernel(%arg0: i32, %arg1: memref<1x16x1xf32, #tpu.memory_space<vmem>>, %arg2: memref<2x16x512xf32, #tpu.memory_space<vmem>>, %arg3: memref<2x512xf32, #tpu.memory_space<vmem>>) attributes {dimension_semantics = [#tpu.dimension_semantics<parallel>], iteration_bounds = array<i64: 2>, scalar_prefetch = 0 : i64, scratch_operands = 0 : i64, tpu.core_type = #tpu.core_type<tc>, window_params = [{pipeline_mode = #tpu.pipeline_mode<synchronous>, transform_indices = @transform_0, window_bounds = array<i64: 1, 16, 1>}, {transform_indices = @transform_1, window_bounds = array<i64: 2, 16, 512>}, {transform_indices = @transform_2, window_bounds = array<i64: 2, 512>}]} {
    %c0 = arith.constant 0 : index
    %c0_0 = arith.constant 0 : index
    %c0_1 = arith.constant 0 : index
    %0 = vector.load %arg2[%c0, %c0_0, %c0_1] : memref<2x16x512xf32, #tpu.memory_space<vmem>>, vector<2x16x512xf32>
    %c0_2 = arith.constant 0 : index
    %c0_3 = arith.constant 0 : index
    %c0_4 = arith.constant 0 : index
    %1 = vector.load %arg1[%c0_2, %c0_3, %c0_4] : memref<1x16x1xf32, #tpu.memory_space<vmem>>, vector<1x16x1xf32>
    %2 = vector.broadcast %1 : vector<1x16x1xf32> to vector<2x16x512xf32>
    %3 = arith.mulf %0, %2 : vector<2x16x512xf32>
    %cst = arith.constant dense<0.000000e+00> : vector<2x512xf32>
    %4 = vector.multi_reduction <add>, %3, %cst [1] : vector<2x16x512xf32> to vector<2x512xf32>
    %c0_5 = arith.constant 0 : index
    %c0_6 = arith.constant 0 : index
    %5 = vector.load %arg3[%c0_5, %c0_6] : memref<2x512xf32, #tpu.memory_space<vmem>>, vector<2x512xf32>
    tpu.vector_store %arg3[%c0_5, %c0_6], %4 {strides = array<i32>} : memref<2x512xf32, #tpu.memory_space<vmem>>, vector<2x512xf32>,
    return
  }
  func.func @transform_0(%arg0: i32) -> (i32, i32, i32) {
    %c0_i32 = arith.constant 0 : i32
    %c0_i32_0 = arith.constant 0 : i32
    %c0_i32_1 = arith.constant 0 : i32
    %c0_i32_2 = arith.constant 0 : i32
    return %c0_i32, %c0_i32_0, %c0_i32_1 : i32, i32, i32
  }
  func.func @transform_1(%arg0: i32) -> (i32, i32, i32) {
    %c0_i32 = arith.constant 0 : i32
    %c0_i32_0 = arith.constant 0 : i32
    %c0_i32_1 = arith.constant 0 : i32
    return %c0_i32, %c0_i32_0, %arg0 : i32, i32, i32
  }
  func.func @transform_2(%arg0: i32) -> (i32, i32) {
    %c0_i32 = arith.constant 0 : i32
    %c0_i32_0 = arith.constant 0 : i32
    return %c0_i32, %arg0 : i32, i32
  }
}

</mosaic_0001>

<bundles_post_ra>
// kernel: tpu_custom_call.1
= control target key start
LH: loop header
LB: loop body
LE: loop exit
PB: predicated region body
PF: predicated region fallthrough
CT: control target
= control target key end

     0   :  { %7 = vsyncpa [#allocation3], 0  ;;  %s769_s0 = inlined_call_operand.vmem [shape: f32[1,16,1], index: 0, kind: input, shape index: {}]   ;;  %s770_s1 = inlined_call_operand.hbm [shape: f32[2,16,1024], index: 1, kind: input, shape index: {}]   ;;  %s771_s2 = inlined_call_operand.hbm [shape: f32[2,1024], index: 2, kind: output, shape index: {}]  }
   0x1   :  { %9 = vsyncpa [#allocation3 + $0x1], 0 }
   0x2   :  { %10 = vsyncpa [#allocation4], 0 }
   0x3   :  { %12 = vsyncpa [#allocation4 + $0x1], 0  ;;  %s590_s9 = smov 0   ;;  %s592_s10 = smov 0  }
   0x4   :  { %s594_s11 = smov 0   ;;  %s596_s12 = smov 0  }
   0x5 LB: > { %s611_s13 = sadd.s32 4294967295, %s566_s12   ;;  %s406_s14 = sadd.s32 4294967294, %s566_s12   ;;  %s566_s12 = sphi %s596_s12, %s787_s12   ;;  %s562_s11 = sphi %s594_s11, %s786_s11   ;;  %s558_s10 = sphi %s592_s10, %s785_s10   ;;  %s554_s9 = sphi %s590_s9, %s784_s9  }
   0x6   : > { %s615_s15 = sadd.s32 1, %s566_s12   ;;  %s46_s16 = sadd.s32 1, %s562_s11 }
   0x7   : > { %s43_s17 = ssub.s32 %s566_s12, %s615_s15  ;;  %p53_p0 = scmp.ne.s32.totalorder %s562_s11, %s558_s10 }
   0x8   : > { %p44_p1 = scmp.eq.s32.totalorder %s43_s17, 0  ;;  %p54_p2 = scmp.eq.s32.totalorder %s566_s12, 0 }
   0x9   : > { %p59_p3 = scmp.ne.s32.totalorder %s558_s10, %s554_s9  ;;  %p60_p4 = scmp.eq.s32.totalorder %s611_s13, 0 }
   0xa   : > { %s627_s18 = scalar_select %p44_p1, %s562_s11, %s46_s16  }
   0xb   : > { %p629_p5 = por %p54_p2, %p53_p0  ;;  %p633_p6 = por %p60_p4, %p59_p3 }
   0xc   : > { %p83_p7 = scmp.eq.s32.totalorder %s611_s13, 1  ;;  %p89_p8 = scmp.eq.s32.totalorder %s406_s14, 1 }
   0xd   : > { %s775_s20 = scalar_select %p633_p6, 1, 0 }
   0xe   : > { %p434_p10 = scmp.lt.s32.totalorder %s566_s12, 2  ;;  %p640_p11 = por %p83_p7, %p53_p0 }
   0xf   : > { %p644_p12 = por %p89_p8, %p59_p3  ;;  %s112_s23 = sand.u32 1, %s562_s11  }
  0x10   : > { %s776_s21 = scalar_select %p640_p11, 1, 0 }
  0x11   : > { %s777_s22 = scalar_select %p644_p12, 1, 0 }
  0x12   : > { %s420_s24 = sshll.u32 %s566_s12, 9  ;;  %s409_s25 = sshll.u32 %s112_s23, 7 }
  0x13   : > { %s653_s28 = scalar_lea.hbm %s770_s1, %s420_s24  ;;  %s116_s29 = scalar_lea.vmem [#allocation2], %s409_s25 }
  0x14   : > { %s123_s30 = sshll.u32 %s116_s29, 4  ;;  %p657_p13 = pnand %p434_p10, %p629_p5  ;;  %s661_s30 = int_to_ptr.vmem [resolvable:$true] %s123_s30 }
  0x15   : > { %s664_s4 = scalar_lea.sflag [#allocation3], %s112_s23  ;;  %s474_s5 = scalar_lea.hbm %s653_s28, 2048 }
  0x16   : > { %p475_p1 = scmp.ne.s32.totalorder %s653_s28, %s474_s5  ;;  %p476_p2 = pneg %p657_p13 }
  0x17   : > { %s479_s8 = scalar_lea.hbm %s770_s1, 4096  ;;  %p480_p5 = scmp.lt.s32.totalorder %s653_s28, %s770_s1 }
  0x18   : > { %p477_p3 = pnand %p476_p2, %p475_p1  ;;  %p481_p7 = scmp.lt.s32.totalorder %s479_s8, %s474_s5 }
  0x1a   : > { %p478_p4 = pneg %p477_p3  ;;  %p482_p8 = por %p481_p7, %p480_p5 }
  0x1c   : > { %p483_p10 = pnand %p482_p8, %p478_p4 }
  0x1e   : > { %486 = shalt.err (!%p483_p10)
}
  0x1f   : > { %s487_s17 = scalar_lea.vmem %s661_s30, 2048  ;;  %s568_s19 = smov [#allocation2]  }
  0x20   : > { %p488_p9 = scmp.ne.s32.totalorder %s661_s30, %s487_s17  ;;  %s492_s23 = sshll.u32 %s568_s19, 4  ;;  %s493_s23 = int_to_ptr.vmem [resolvable:$false] %s492_s23 }
  0x21   : > { %s494_s24 = scalar_lea.vmem %s493_s23, 4096  ;;  %p495_p3 = scmp.lt.s32.totalorder %s661_s30, %s493_s23 }
  0x22   : > { %p490_p0 = pnand %p488_p9, %p476_p2  ;;  %p496_p12 = scmp.lt.s32.totalorder %s494_s24, %s487_s17 }
  0x24   : > { %p491_p1 = pneg %p490_p0  ;;  %p497_p11 = por %p496_p12, %p495_p3 }
  0x26   : > { %p498_p6 = pnand %p497_p11, %p491_p1 }
  0x28   : > { %501 = shalt.err (!%p498_p6)
}
  0x29   : > { %s569_s25 = smov 1024   ;;  %s570_s26 = smov 512  }
  0x2a   : > { %s571_s27 = smov 32   ;;  %p131_p9 = scmp.lt.s32.totalorder %s566_s12, 3 }
  0x2b   : > { %429 = dma.hbm_to_vmem [thread:$0]  (!%p657_p13), %s653_s28, 2048, %s661_s30, %s664_s4, %s569_s25, %s570_s26, %s571_s27  }
  0x2c   : > { %p779_p0 = scmp.ge.s32.totalorder %s566_s12, 1 }
  0x2e   : > { %p132_p2 = pnand %p779_p0, %p131_p9 }
  0x2f   : > { %s689_s29 = sand.u32 (!%p132_p2), 1, %s558_s10   ;;  %p780_p6 = scmp.ne.s32.totalorder (!%p132_p2), %s775_s20, 0 }
  0x30   : > { %135 = sbr.rel (%p132_p2) target bundleno = 226 (0xe2), region = 28  ;;  %s413_s5 = sshll.u32 (!%p132_p2), %s689_s29, 7 }
  0x31   : > { %s138_s6 = scalar_lea.sflag (!%p132_p2), [#allocation3], %s689_s29  ;;  %s693_s7 = scalar_lea.vmem (!%p132_p2), [#allocation2], %s413_s5 }
  0x35   : > { %545 = dma.done.wait (%p780_p6), %s138_s6, 2048  }
  0x36   : > { %547 = vsyncadd (%p780_p6), %s138_s6, 4294965248  ;;  %v572_v0 = vmov 0   ;;  %v180_v1 = vld [vmem:[%s769_s0] sm:$0xff]  ;;  %v181_v2 = vld [vmem:[%s769_s0 + $0x8] sm:$0xff]  ;;  %v573_v3 = vmov 1983009808   ;;  %v277_v5 = vlaneseq }
  0x37   : > { %473 = vset.pattern.permute.xlu0 %v572_v0  ;;  %v275_v4 = vunpack.c.l.s4 %v573_v3  ;;  %v164_v6 = vld [vmem:[%s693_s7] sm:$0xff]  ;;  %v165_v9 = vld [vmem:[%s693_s7 + $0x8] sm:$0xff]  ;;  %v166_v10 = vld [vmem:[%s693_s7 + $0x10] sm:$0xff]  ;;  %s414_s20 = sshll.u32 %s689_s29, 3  ;;  %vm311_vm0 = vcmask 1041409   ;;  %vm313_vm1 = vcmask 1043459  }
  0x38   : > { %184 = vperm.xlu0 %473, %v180_v1   ;;  %v278_v8 = vshrl.u32 %v277_v5, 7  ;;  %v167_v11 = vld [vmem:[%s693_s7 + $0x18] sm:$0xff]  ;;  %v168_v13 = vld [vmem:[%s693_s7 + $0x20] sm:$0xff]  ;;  %v169_v14 = vld [vmem:[%s693_s7 + $0x28] sm:$0xff]  ;;  %vm315_vm2 = vcmask 1045509   ;;  %s421_s8 = sshll.u32 %s611_s13, 7 }
  0x39   : > { %v276_v7 = vunpack.c.0.s8 %v275_v4  ;;  %v172_v15 = vld [vmem:[%s693_s7 + $0x40] sm:$0xff]  ;;  %v173_v16 = vld [vmem:[%s693_s7 + $0x48] sm:$0xff]  ;;  %v174_v17 = vld [vmem:[%s693_s7 + $0x50] sm:$0xff]  ;;  %s161_s14 = scalar_lea.vmem [#allocation5], %s414_s20  ;;  %vm317_vm3 = vcmask 1047559   ;;  %s732_s23 = scalar_lea.hbm %s771_s2, %s421_s8 }
  0x3a   : > { %v175_v18 = vld [vmem:[%s693_s7 + $0x58] sm:$0xff]  ;;  %v170_v19 = vld [vmem:[%s693_s7 + $0x30] sm:$0xff]  ;;  %v176_v21 = vld [vmem:[%s693_s7 + $0x60] sm:$0xff]  ;;  %s336_s16 = sshll.u32 %s161_s14, 4  ;;  %s322_s24 = scalar_lea.sflag [#allocation4], %s689_s29  ;;  %s337_s16 = int_to_ptr.vmem [resolvable:$true] %s336_s16 }
  0x3b   : > { %v171_v20 = vld [vmem:[%s693_s7 + $0x38] sm:$0xff]  ;;  %v718_v22 = vsub.s32 %v276_v7, %v278_v8  ;;  %v177_v23 = vld [vmem:[%s693_s7 + $0x68] sm:$0xff]  ;;  %v178_v24 = vld [vmem:[%s693_s7 + $0x70] sm:$0xff]  ;;  %s502_s25 = scalar_lea.vmem %s337_s16, 128  ;;  %p781_p12 = scmp.ne.s32.totalorder %s776_s21, 0 }
  0x3c   : > { %189 = vperm.xlu0 %473, %v181_v2   ;;  %v179_v25 = vld [vmem:[%s693_s7 + $0x78] sm:$0xff]  ;;  %p503_p11 = scmp.ne.s32.totalorder %s337_s16, %s502_s25  ;;  %s574_s13 = smov [#allocation5]  }
  0x3d   : > { %s506_s26 = sshll.u32 %s574_s13, 4  ;;  %s507_s26 = int_to_ptr.vmem [resolvable:$false] %s506_s26 }
  0x3e   : > { %p504_p13 = pnand %p503_p11, %p781_p12  ;;  %s508_s27 = scalar_lea.vmem %s507_s26, 256 }
  0x3f   : > { %p509_p5 = scmp.lt.s32.totalorder %s337_s16, %s507_s26  ;;  %p510_p7 = scmp.lt.s32.totalorder %s508_s27, %s502_s25 }
  0x40   : > { %p505_p4 = pneg %p504_p13 }
  0x41   : > { %p511_p8 = por %p510_p7, %p509_p5 }
  0x43   : > { %p512_p10 = pnand %p511_p8, %p505_p4 }
  0xb3   : > { %v185_v12 = vpop.permute.xlu0 %184 }
  0xb4   : > { %v192_v26 = vmul.f32 %v185_v12, %v164_v6  ;;  %v193_v27 = vmul.f32 %v185_v12, %v165_v9  ;;  %v194_v28 = vmul.f32 %v185_v12, %v166_v10  ;;  %v195_v29 = vmul.f32 %v185_v12, %v167_v11 }
  0xb5   : > { %v200_v31 = vmul.f32 %v185_v12, %v172_v15  ;;  %v201_v32 = vmul.f32 %v185_v12, %v173_v16  ;;  %v202_v33 = vmul.f32 %v185_v12, %v174_v17  ;;  %v203_v34 = vmul.f32 %v185_v12, %v175_v18 }
  0xb7   : > { %v190_v30 = vpop.permute.xlu0 %189 }
  0xb8   : > { %v196_v35 = vmul.f32 %v190_v30, %v168_v13  ;;  %v197_v36 = vmul.f32 %v190_v30, %v169_v14  ;;  %v198_v37 = vmul.f32 %v190_v30, %v170_v19  ;;  %v199_v38 = vmul.f32 %v190_v30, %v171_v20 }
  0xb9   : > { %v204_v39 = vmul.f32 %v190_v30, %v176_v21  ;;  %v205_v40 = vmul.f32 %v190_v30, %v177_v23  ;;  %v206_v41 = vmul.f32 %v190_v30, %v178_v24  ;;  %v207_v42 = vmul.f32 %v190_v30, %v179_v25 }
  0xba   : > { %v208_v43 = vadd.f32 %v196_v35, %v192_v26  ;;  %v215_v44 = vadd.f32 %v197_v36, %v193_v27  ;;  %v222_v45 = vadd.f32 %v198_v37, %v194_v28  ;;  %v229_v46 = vadd.f32 %v199_v38, %v195_v29 }
  0xbb   : > { %v236_v47 = vadd.f32 %v204_v39, %v200_v31  ;;  %v243_v48 = vadd.f32 %v205_v40, %v201_v32  ;;  %v250_v49 = vadd.f32 %v206_v41, %v202_v33  ;;  %v257_v50 = vadd.f32 %v207_v42, %v203_v34 }
  0xbc   : > { %v209_v51 = vrot.slane %v208_v43, 4  ;;  %v216_v52 = vrot.slane %v215_v44, 4  ;;  %v223_v53 = vrot.slane %v222_v45, 4  ;;  %v230_v54 = vrot.slane %v229_v46, 4 }
  0xbd   : > { %v237_v55 = vrot.slane %v236_v47, 4  ;;  %v244_v56 = vrot.slane %v243_v48, 4  ;;  %v251_v57 = vrot.slane %v250_v49, 4  ;;  %v258_v58 = vrot.slane %v257_v50, 4 }
  0xbe   : > { %v210_v59 = vadd.f32 %v209_v51, %v208_v43  ;;  %v217_v60 = vadd.f32 %v216_v52, %v215_v44  ;;  %v224_v61 = vadd.f32 %v223_v53, %v222_v45  ;;  %v231_v62 = vadd.f32 %v230_v54, %v229_v46 }
  0xbf   : > { %v238_v63 = vadd.f32 %v237_v55, %v236_v47  ;;  %v245_v0 = vadd.f32 %v244_v56, %v243_v48  ;;  %v252_v1 = vadd.f32 %v251_v57, %v250_v49  ;;  %v259_v2 = vadd.f32 %v258_v58, %v257_v50 }
  0xc0   : > { %v211_v3 = vrot.slane %v210_v59, 2  ;;  %v218_v4 = vrot.slane %v217_v60, 2  ;;  %v225_v5 = vrot.slane %v224_v61, 2  ;;  %v232_v6 = vrot.slane %v231_v62, 2 }
  0xc1   : > { %v239_v7 = vrot.slane %v238_v63, 2  ;;  %v246_v8 = vrot.slane %v245_v0, 2  ;;  %v253_v9 = vrot.slane %v252_v1, 2  ;;  %v260_v10 = vrot.slane %v259_v2, 2 }
  0xc2   : > { %v212_v11 = vadd.f32 %v211_v3, %v210_v59  ;;  %v219_v12 = vadd.f32 %v218_v4, %v217_v60  ;;  %v226_v13 = vadd.f32 %v225_v5, %v224_v61  ;;  %v233_v14 = vadd.f32 %v232_v6, %v231_v62 }
  0xc3   : > { %v240_v15 = vadd.f32 %v239_v7, %v238_v63  ;;  %v247_v16 = vadd.f32 %v246_v8, %v245_v0  ;;  %v254_v17 = vadd.f32 %v253_v9, %v252_v1  ;;  %v261_v18 = vadd.f32 %v260_v10, %v259_v2 }
  0xc4   : > { %v213_v19 = vrot.slane %v212_v11, 1  ;;  %v220_v20 = vrot.slane %v219_v12, 1  ;;  %v227_v21 = vrot.slane %v226_v13, 1  ;;  %v234_v23 = vrot.slane %v233_v14, 1 }
  0xc5   : > { %v241_v24 = vrot.slane %v240_v15, 1  ;;  %v248_v25 = vrot.slane %v247_v16, 1  ;;  %v255_v26 = vrot.slane %v254_v17, 1  ;;  %v262_v27 = vrot.slane %v261_v18, 1 }
  0xc6   : > { %v214_v28 = vadd.f32 %v213_v19, %v212_v11  ;;  %v221_v29 = vadd.f32 %v220_v20, %v219_v12  ;;  %v228_v30 = vadd.f32 %v227_v21, %v226_v13  ;;  %v235_v31 = vadd.f32 %v234_v23, %v233_v14 }
  0xc7   : > { %v242_v32 = vadd.f32 %v241_v24, %v240_v15  ;;  %v249_v33 = vadd.f32 %v248_v25, %v247_v16  ;;  %v256_v34 = vadd.f32 %v255_v26, %v254_v17  ;;  %v263_v35 = vadd.f32 %v262_v27, %v261_v18 }
  0xc8   : > { %v272_v36 = vcombine.low %v214_v28, %v221_v29  ;;  %v273_v37 = vcombine.low %v228_v30, %v235_v31 }
  0xc9   : > { %v289_v38 = vcombine.low %v242_v32, %v249_v33  ;;  %v290_v39 = vcombine.low %v256_v34, %v263_v35 }
  0xca   : > { %v280_v40 = vrot.slane %v272_v36, %v718_v22  ;;  %v287_v41 = vrot.slane %v273_v37, %v718_v22 }
  0xcb   : > { %v297_v42 = vrot.slane %v289_v38, %v718_v22  ;;  %v304_v43 = vrot.slane %v290_v39, %v718_v22 }
  0xcc   : > { %v288_v45 = vcombine.low %v280_v40, %v287_v41 }
  0xcd   : > { %v305_v44 = vcombine.low %v297_v42, %v304_v43 }
  0xcf   : > { %v310_v46 = vrot.slane %v305_v44, 7 }
  0xd1   : > { %v312_v47 = vsel %vm311_vm0, %v310_v46, %v288_v45 }
  0xd2   : > { %v314_v48 = vsel %vm313_vm1, %v310_v46, %v312_v47 }
  0xd3   : > { %v316_v49 = vsel %vm315_vm2, %v310_v46, %v314_v48 }
  0xd4   : > { %v318_v22 = vsel %vm317_vm3, %v310_v46, %v316_v49 }
  0xd5   : > { %320 = vst [vmem:[%s161_s14] sm:$0xff] %v318_v22 }
  0xd6   : > { %515 = shalt.err (!%p512_p10)
}
  0xd7   : > { %s516_s5 = scalar_lea.hbm %s732_s23, 128  ;;  %s520_s7 = scalar_lea.hbm %s771_s2, 256 }
  0xd8   : > { %p517_p1 = scmp.ne.s32.totalorder %s732_s23, %s516_s5  ;;  %p521_p0 = scmp.lt.s32.totalorder %s732_s23, %s771_s2 }
  0xd9   : > { %p522_p2 = scmp.lt.s32.totalorder %s520_s7, %s516_s5 }
  0xda   : > { %p518_p3 = pnand %p517_p1, %p781_p12 }
  0xdb   : > { %p523_p6 = por %p522_p2, %p521_p0 }
  0xdc   : > { %p519_p9 = pneg %p518_p3 }
  0xde   : > { %p524_p11 = pnand %p523_p6, %p519_p9 }
  0xe0   : > { %527 = shalt.err (!%p524_p11)
}
  0xe1   : > { %424 = dma.vmem_to_hbm [thread:$0]  (%p781_p12), %s337_s16, 128, %s732_s23, %s322_s24  }
  0xe2 PF: > { %s348_s3 = sand.u32 1, %s554_s9   ;;  %p782_p13 = scmp.ne.s32.totalorder %s777_s22, 0 }
  0xe3   : > { %p783_p4 = scmp.ge.s32.totalorder %s566_s12, 2  ;;  %s349_s4 = scalar_lea.sflag [#allocation4], %s348_s3 }
  0xe5   : > { %p431_p5 = pnand %p783_p4, %p782_p13 }
  0xe7   : > { %p432_p7 = pneg %p431_p5 }
  0xe9   : > { %549 = dma.done.wait (%p432_p7), %s349_s4, 128  }
  0xea   : > { %551 = vsyncadd (%p432_p7), %s349_s4, 4294967168  ;;  %p15_p8 = scmp.ge.s32.totalorder %s615_s15, 4   ;;  %s784_s9 = smov %s558_s10 }
  0xeb   : > { %s785_s10 = smov %s562_s11  ;;  %s786_s11 = smov %s627_s18 }
  0xec   : > { %s787_s12 = smov %s615_s15  ;;  %17 = sbr.rel (!%p15_p8) target bundleno = 5 (0x5), region = 73 }
  0xf1   :  { %354 = vsyncpa [#allocation3], 1 }
  0xf2   :  { %356 = vsyncpa [#allocation3 + $0x1], 1 }
  0xf3   :  { %357 = vsyncpa [#allocation4], 1 }
  0xf4   :  { %359 = vsyncpa [#allocation4 + $0x1], 1 }

</bundles_post_ra>
